<compile_context>
chip_gen: v7x
topology: tpu7x:2x2x1
jax: 0.10.0
libtpu: 0.0.40
codegen_flags: <defaults>
</compile_context>

<pallas_src>
import math
import functools

import jax
import jax.numpy as jnp
from jax.experimental import pallas as pl
from jax.experimental.pallas import tpu as pltpu


# ----------------------------------------------------------------------------
# Param packing (done ONCE at param-build time, not per forward call).
# ----------------------------------------------------------------------------
def pack_params(params, n_head):
    """Pre-transpose / concatenate weights and fold in rotate_half + scale."""
    wq, wk, wv, wo = params["wq"], params["wk"], params["wv"], params["wo"]
    bq, bk, bv, bo = params["bq"], params["bk"], params["bv"], params["bo"]
    n_attn = wq.shape[0]
    hs = n_attn // n_head
    r = int(hs * 0.5)          # rotary_ndims
    half = r // 2
    scale = 1.0 / math.sqrt(hs)

    # Per-head signed permutation:  (x @ P) == rotate_half(x[..., :r]) padded
    # with zeros on the pass-through dims.
    P = jnp.zeros((hs, hs), jnp.float32)
    idx = jnp.arange(half)
    P = P.at[idx + half, idx].set(-1.0)   # out[:, c]        = -x[:, c + r/2]
    P = P.at[idx, idx + half].set(1.0)    # out[:, c + r/2]  =  x[:, c]
    P_full = jnp.kron(jnp.eye(n_head, dtype=jnp.float32), P)   # block-diag

    wqT = wq.T * scale          # fold 1/sqrt(hs) into Q projection
    wkT = wk.T
    bq_s = bq * scale

    # (C, 5*n_attn): [Q, K, V, rotate_half(Q), rotate_half(K)]
    w_big = jnp.concatenate([wqT, wkT, wv.T, wqT @ P_full, wkT @ P_full], axis=1)
    b_big = jnp.concatenate([bq_s, bk, bv, bq_s @ P_full, bk @ P_full])[None, :]

    return {
        "w_big": w_big.astype(jnp.float32),
        "b_big": b_big.astype(jnp.float32),
        "wo_t": wo.T.astype(jnp.float32),          # (n_attn, n_embd)
        "bo": bo[None, :].astype(jnp.float32),     # (1, n_embd)
    }


def _rotary_tables(T, hs, n_head):
    """cos/sin tables padded to full head width and tiled across heads."""
    r = int(hs * 0.5)
    inv_freq = 1.0 / (10000.0 ** (jnp.arange(0, r, 2, dtype=jnp.float32) / r))
    t = jnp.arange(T, dtype=jnp.float32)
    freqs = jnp.einsum("i,j->ij", t, inv_freq)          # (T, r/2)
    emb = jnp.concatenate([freqs, freqs], axis=-1)      # (T, r)
    cos_full = jnp.concatenate(
        [jnp.cos(emb), jnp.ones((T, hs - r), jnp.float32)], axis=-1)   # (T, hs)
    sin_full = jnp.concatenate(
        [jnp.sin(emb), jnp.zeros((T, hs - r), jnp.float32)], axis=-1)  # (T, hs)
    return jnp.tile(cos_full, (1, n_head)), jnp.tile(sin_full, (1, n_head))


# ----------------------------------------------------------------------------
# Fused kernel: one grid step == one batch element.
# ----------------------------------------------------------------------------
def _fused_kernel(x_ref, w_ref, b_ref, cos_ref, sin_ref, wo_ref, bo_ref, o_ref,
                  *, n_head, head_size):
    na = n_head * head_size
    x = x_ref[0]                                     # (T, C)
    T = x.shape[0]

    # Fused QKV (+ rotate_half'ed Q/K) projection: single MXU pass,
    # lane-dense (T, 5*n_attn) result.
    qkv = jnp.dot(x, w_ref[...], preferred_element_type=jnp.float32) + b_ref[...]

    cos = cos_ref[...]                               # (T, n_attn), 1 on pass-through
    sin = sin_ref[...]                               # (T, n_attn), 0 on pass-through
    q = qkv[:, 0 * na:1 * na] * cos + qkv[:, 3 * na:4 * na] * sin   # scaled by 1/sqrt(hs)
    k = qkv[:, 1 * na:2 * na] * cos + qkv[:, 4 * na:5 * na] * sin
    v = qkv[:, 2 * na:3 * na]

    # Causal mask (built once, reused by every head).
    row = jax.lax.broadcasted_iota(jnp.int32, (T, T), 0)
    col = jax.lax.broadcasted_iota(jnp.int32, (T, T), 1)
    causal = row >= col

    wo = wo_ref[...]                                 # (n_attn, n_embd)
    acc = jnp.zeros((T, wo.shape[1]), jnp.float32)

    for h in range(n_head):
        sl = slice(h * head_size, (h + 1) * head_size)
        q_h, k_h, v_h = q[:, sl], k[:, sl], v[:, sl]

        # QK^T without an explicit transpose: contract last dims of both.
        s = jax.lax.dot_general(
            q_h, k_h,
            dimension_numbers=(((1,), (1,)), ((), ())),
            preferred_element_type=jnp.float32)                       # (T, T)
        s = jnp.where(causal, s, -1e30)

        m = jnp.max(s, axis=-1, keepdims=True)
        p = jnp.exp(s - m)
        denom = jnp.sum(p, axis=-1, keepdims=True)
        p = p * pl.reciprocal(denom, approx=True)                     # EUP slot

        o_h = jnp.dot(p, v_h, preferred_element_type=jnp.float32)     # (T, hs)
        # Output projection fused into the head loop.
        acc = acc + jnp.dot(o_h, wo[sl, :], preferred_element_type=jnp.float32)

    o_ref[0] = (acc + bo_ref[...]).astype(o_ref.dtype)


def mha_rotary_forward(x, packed, n_head):
    """x: (B, T, C) float32; packed: output of pack_params."""
    B, T, C = x.shape
    n_attn, n_out = packed["wo_t"].shape
    hs = n_attn // n_head
    cos_big, sin_big = _rotary_tables(T, hs, n_head)

    kernel = functools.partial(_fused_kernel, n_head=n_head, head_size=hs)
    return pl.pallas_call(
        kernel,
        out_shape=jax.ShapeDtypeStruct((B, T, n_out), jnp.float32),
        grid=(B,),
        in_specs=[
            pl.BlockSpec((1, T, C), lambda b: (b, 0, 0)),              # x
            pl.BlockSpec((C, 5 * n_attn), lambda b: (0, 0)),           # packed W^T
            pl.BlockSpec((1, 5 * n_attn), lambda b: (0, 0)),           # packed bias
            pl.BlockSpec((T, n_attn), lambda b: (0, 0)),               # cos
            pl.BlockSpec((T, n_attn), lambda b: (0, 0)),               # sin
            pl.BlockSpec((n_attn, n_out), lambda b: (0, 0)),           # Wo^T
            pl.BlockSpec((1, n_out), lambda b: (0, 0)),                # bo
        ],
        out_specs=pl.BlockSpec((1, T, n_out), lambda b: (b, 0, 0)),
        compiler_params=pltpu.CompilerParams(
            dimension_semantics=("parallel",)),
    )(x, packed["w_big"], packed["b_big"], cos_big, sin_big,
      packed["wo_t"], packed["bo"])


# ----------------------------------------------------------------------------
# Pure-JAX reference (mirrors the PyTorch forward) for a sanity check.
# ----------------------------------------------------------------------------
def reference_forward(x, params, n_head):
    B, T, C = x.shape
    n_attn = params["wq"].shape[0]
    hs = n_attn // n_head
    r = int(hs * 0.5)

    def lin(xx, w, b):
        return xx @ w.T + b

    q = lin(x, params["wq"], params["bq"]).reshape(B, T, n_head, hs).transpose(0, 2, 1, 3)
    k = lin(x, params["wk"], params["bk"]).reshape(B, T, n_head, hs).transpose(0, 2, 1, 3)
    v = lin(x, params["wv"], params["bv"]).reshape(B, T, n_head, hs).transpose(0, 2, 1, 3)

    qr, qp = q[..., :r], q[..., r:]
    kr, kp = k[..., :r], k[..., r:]

    inv_freq = 1.0 / (10000.0 ** (jnp.arange(0, r, 2, dtype=jnp.float32) / r))
    t = jnp.arange(T, dtype=jnp.float32)
    freqs = jnp.einsum("i,j->ij", t, inv_freq)
    emb = jnp.concatenate([freqs, freqs], axis=-1)
    cos, sin = jnp.cos(emb), jnp.sin(emb)

    def rotate_half(xx):
        x1, x2 = xx[..., : xx.shape[-1] // 2], xx[..., xx.shape[-1] // 2 :]
        return jnp.concatenate([-x2, x1], axis=-1)

    qr = qr * cos + rotate_half(qr) * sin
    kr = kr * cos + rotate_half(kr) * sin
    q = jnp.concatenate([qr, qp], axis=-1)
    k = jnp.concatenate([kr, kp], axis=-1)

    att = (q @ jnp.swapaxes(k, -2, -1)) * (1.0 / math.sqrt(hs))
    mask = jnp.tril(jnp.ones((T, T), jnp.float32))
    att = jnp.where(mask == 0, -jnp.inf, att)
    att = jax.nn.softmax(att, axis=-1)
    o = (att @ v).transpose(0, 2, 1, 3).reshape(B, T, n_attn)
    return lin(o, params["wo"], params["bo"])


if __name__ == "__main__":
    # Config: n_embd=32, n_attn=32, n_head=4 (head_size=8, rotary_ndims=4),
    # batch=2, seq=8.
    B, T, n_embd, n_attn, n_head = 2, 8, 32, 32, 4

    key = jax.random.PRNGKey(0)
    ks = jax.random.split(key, 9)
    scale_in = 1.0 / math.sqrt(n_embd)
    scale_attn = 1.0 / math.sqrt(n_attn)
    params = {
        "wq": jax.random.uniform(ks[0], (n_attn, n_embd), jnp.float32, -scale_in, scale_in),
        "bq": jax.random.uniform(ks[1], (n_attn,), jnp.float32, -scale_in, scale_in),
        "wk": jax.random.uniform(ks[2], (n_attn, n_embd), jnp.float32, -scale_in, scale_in),
        "bk": jax.random.uniform(ks[3], (n_attn,), jnp.float32, -scale_in, scale_in),
        "wv": jax.random.uniform(ks[4], (n_attn, n_embd), jnp.float32, -scale_in, scale_in),
        "bv": jax.random.uniform(ks[5], (n_attn,), jnp.float32, -scale_in, scale_in),
        "wo": jax.random.uniform(ks[6], (n_embd, n_attn), jnp.float32, -scale_attn, scale_attn),
        "bo": jax.random.uniform(ks[7], (n_embd,), jnp.float32, -scale_attn, scale_attn),
    }
    x = jax.random.normal(ks[8], (B, T, n_embd), jnp.float32)

    packed = jax.tree_util.tree_map(jax.block_until_ready,
                                    pack_params(params, n_head))   # one-time packing

    fwd = jax.jit(functools.partial(mha_rotary_forward, n_head=n_head))
    out = jax.block_until_ready(fwd(x, packed))

    ref = reference_forward(x, params, n_head)
    assert out.shape == (B, T, n_embd)
    # Tolerance loosened slightly vs. exact-divide softmax because the kernel
    # uses the approximate EUP reciprocal for the softmax normalization.
    assert jnp.allclose(out, ref, atol=5e-3, rtol=5e-3), "mismatch vs reference"

    print("KERNEL_OK")
</pallas_src>

<mosaic_0001>
module attributes {stable_mosaic.version = 11 : i64} {
  func.func @_fused_kernel(%arg0: i32, %arg1: memref<1x8x32xf32, #tpu.memory_space<vmem>>, %arg2: memref<32x160xf32, #tpu.memory_space<vmem>>, %arg3: memref<1x160xf32, #tpu.memory_space<vmem>>, %arg4: memref<8x32xf32, #tpu.memory_space<vmem>>, %arg5: memref<8x32xf32, #tpu.memory_space<vmem>>, %arg6: memref<32x32xf32, #tpu.memory_space<vmem>>, %arg7: memref<1x32xf32, #tpu.memory_space<vmem>>, %arg8: memref<1x8x32xf32, #tpu.memory_space<vmem>>) attributes {dimension_semantics = [#tpu.dimension_semantics<parallel>], iteration_bounds = array<i64: 2>, scalar_prefetch = 0 : i64, scratch_operands = 0 : i64, tpu.core_type = #tpu.core_type<tc>, window_params = [{transform_indices = @transform_0, window_bounds = array<i64: 1, 8, 32>}, {pipeline_mode = #tpu.pipeline_mode<synchronous>, transform_indices = @transform_1, window_bounds = array<i64: 32, 160>}, {pipeline_mode = #tpu.pipeline_mode<synchronous>, transform_indices = @transform_2, window_bounds = array<i64: 1, 160>}, {pipeline_mode = #tpu.pipeline_mode<synchronous>, transform_indices = @transform_3, window_bounds = array<i64: 8, 32>}, {pipeline_mode = #tpu.pipeline_mode<synchronous>, transform_indices = @transform_4, window_bounds = array<i64: 8, 32>}, {pipeline_mode = #tpu.pipeline_mode<synchronous>, transform_indices = @transform_5, window_bounds = array<i64: 32, 32>}, {pipeline_mode = #tpu.pipeline_mode<synchronous>, transform_indices = @transform_6, window_bounds = array<i64: 1, 32>}, {transform_indices = @transform_7, window_bounds = array<i64: 1, 8, 32>}]} {
    %c0 = arith.constant 0 : index
    %c0_0 = arith.constant 0 : index
    %c0_1 = arith.constant 0 : index
    %0 = vector.load %arg1[%c0, %c0_0, %c0_1] : memref<1x8x32xf32, #tpu.memory_space<vmem>>, vector<1x8x32xf32>
    %1 = vector.shape_cast %0 : vector<1x8x32xf32> to vector<8x32xf32>
    %c0_2 = arith.constant 0 : index
    %c0_3 = arith.constant 0 : index
    %2 = vector.load %arg2[%c0_2, %c0_3] : memref<32x160xf32, #tpu.memory_space<vmem>>, vector<32x160xf32>
    %cst = arith.constant dense<0.000000e+00> : vector<8x160xf32>
    %3 = tpu.matmul %1, %2, %cst {dimension_numbers = #tpu.dot_dimension_numbers<[1], [0], [0], [1], [0, 0, 1, 1], [], []>} : vector<8x32xf32>, vector<32x160xf32>, vector<8x160xf32> -> vector<8x160xf32>
    %c0_4 = arith.constant 0 : index
    %c0_5 = arith.constant 0 : index
    %4 = vector.load %arg3[%c0_4, %c0_5] : memref<1x160xf32, #tpu.memory_space<vmem>>, vector<1x160xf32>
    %5 = vector.broadcast %4 : vector<1x160xf32> to vector<8x160xf32>
    %6 = arith.addf %3, %5 : vector<8x160xf32>
    %c0_6 = arith.constant 0 : index
    %c0_7 = arith.constant 0 : index
    %7 = vector.load %arg4[%c0_6, %c0_7] : memref<8x32xf32, #tpu.memory_space<vmem>>, vector<8x32xf32>
    %c0_8 = arith.constant 0 : index
    %c0_9 = arith.constant 0 : index
    %8 = vector.load %arg5[%c0_8, %c0_9] : memref<8x32xf32, #tpu.memory_space<vmem>>, vector<8x32xf32>
    %9 = vector.extract_strided_slice %6 {offsets = [0, 0], sizes = [8, 32], strides = [1, 1]} : vector<8x160xf32> to vector<8x32xf32>
    %10 = arith.mulf %9, %7 : vector<8x32xf32>
    %11 = vector.extract_strided_slice %6 {offsets = [0, 96], sizes = [8, 32], strides = [1, 1]} : vector<8x160xf32> to vector<8x32xf32>
    %12 = arith.mulf %11, %8 : vector<8x32xf32>
    %13 = arith.addf %10, %12 : vector<8x32xf32>
    %14 = vector.extract_strided_slice %6 {offsets = [0, 32], sizes = [8, 32], strides = [1, 1]} : vector<8x160xf32> to vector<8x32xf32>
    %15 = arith.mulf %14, %7 : vector<8x32xf32>
    %16 = vector.extract_strided_slice %6 {offsets = [0, 128], sizes = [8, 32], strides = [1, 1]} : vector<8x160xf32> to vector<8x32xf32>
    %17 = arith.mulf %16, %8 : vector<8x32xf32>
    %18 = arith.addf %15, %17 : vector<8x32xf32>
    %19 = vector.extract_strided_slice %6 {offsets = [0, 64], sizes = [8, 32], strides = [1, 1]} : vector<8x160xf32> to vector<8x32xf32>
    %20 = tpu.iota {dimensions = array<i32: 0>} : vector<8x8xi32>
    %21 = tpu.iota {dimensions = array<i32: 1>} : vector<8x8xi32>
    %22 = arith.cmpi sge, %20, %21 : vector<8x8xi32>
    %c0_10 = arith.constant 0 : index
    %c0_11 = arith.constant 0 : index
    %23 = vector.load %arg6[%c0_10, %c0_11] : memref<32x32xf32, #tpu.memory_space<vmem>>, vector<32x32xf32>
    %cst_12 = arith.constant 0.000000e+00 : f32
    %24 = vector.broadcast %cst_12 : f32 to vector<8x32xf32>
    %25 = vector.extract_strided_slice %13 {offsets = [0, 0], sizes = [8, 8], strides = [1, 1]} : vector<8x32xf32> to vector<8x8xf32>
    %26 = vector.extract_strided_slice %18 {offsets = [0, 0], sizes = [8, 8], strides = [1, 1]} : vector<8x32xf32> to vector<8x8xf32>
    %27 = vector.extract_strided_slice %19 {offsets = [0, 0], sizes = [8, 8], strides = [1, 1]} : vector<8x32xf32> to vector<8x8xf32>
    %cst_13 = arith.constant dense<0.000000e+00> : vector<8x8xf32>
    %28 = tpu.matmul %25, %26, %cst_13 {dimension_numbers = #tpu.dot_dimension_numbers<[1], [1], [0], [0], [0, 0, 1, 0], [], []>} : vector<8x8xf32>, vector<8x8xf32>, vector<8x8xf32> -> vector<8x8xf32>
    %cst_14 = arith.constant -1.000000e+30 : f32
    %29 = vector.broadcast %cst_14 : f32 to vector<8x8xf32>
    %30 = arith.select %22, %28, %29 : vector<8x8xi1>, vector<8x8xf32>
    %cst_15 = arith.constant dense<0xFF800000> : vector<8xf32>
    %31 = vector.multi_reduction <maximumf>, %30, %cst_15 [1] : vector<8x8xf32> to vector<8xf32>
    %32 = vector.shape_cast %31 : vector<8xf32> to vector<8x1xf32>
    %33 = vector.broadcast %32 : vector<8x1xf32> to vector<8x8xf32>
    %34 = arith.subf %30, %33 : vector<8x8xf32>
    %35 = math.exp %34 : vector<8x8xf32>
    %cst_16 = arith.constant dense<0.000000e+00> : vector<8xf32>
    %36 = vector.multi_reduction <add>, %35, %cst_16 [1] : vector<8x8xf32> to vector<8xf32>
    %37 = vector.shape_cast %36 : vector<8xf32> to vector<8x1xf32>
    %38 = tpu.reciprocal %37 {approx = true} : vector<8x1xf32> -> vector<8x1xf32>
    %39 = vector.broadcast %38 : vector<8x1xf32> to vector<8x8xf32>
    %40 = arith.mulf %35, %39 : vector<8x8xf32>
    %cst_17 = arith.constant dense<0.000000e+00> : vector<8x8xf32>
    %41 = tpu.matmul %40, %27, %cst_17 {dimension_numbers = #tpu.dot_dimension_numbers<[1], [0], [0], [1], [0, 0, 1, 1], [], []>} : vector<8x8xf32>, vector<8x8xf32>, vector<8x8xf32> -> vector<8x8xf32>
    %42 = vector.extract_strided_slice %23 {offsets = [0, 0], sizes = [8, 32], strides = [1, 1]} : vector<32x32xf32> to vector<8x32xf32>
    %cst_18 = arith.constant dense<0.000000e+00> : vector<8x32xf32>
    %43 = tpu.matmul %41, %42, %cst_18 {dimension_numbers = #tpu.dot_dimension_numbers<[1], [0], [0], [1], [0, 0, 1, 1], [], []>} : vector<8x8xf32>, vector<8x32xf32>, vector<8x32xf32> -> vector<8x32xf32>
    %44 = arith.addf %24, %43 : vector<8x32xf32>
    %45 = vector.extract_strided_slice %13 {offsets = [0, 8], sizes = [8, 8], strides = [1, 1]} : vector<8x32xf32> to vector<8x8xf32>
    %46 = vector.extract_strided_slice %18 {offsets = [0, 8], sizes = [8, 8], strides = [1, 1]} : vector<8x32xf32> to vector<8x8xf32>
    %47 = vector.extract_strided_slice %19 {offsets = [0, 8], sizes = [8, 8], strides = [1, 1]} : vector<8x32xf32> to vector<8x8xf32>
    %cst_19 = arith.constant dense<0.000000e+00> : vector<8x8xf32>
    %48 = tpu.matmul %45, %46, %cst_19 {dimension_numbers = #tpu.dot_dimension_numbers<[1], [1], [0], [0], [0, 0, 1, 0], [], []>} : vector<8x8xf32>, vector<8x8xf32>, vector<8x8xf32> -> vector<8x8xf32>
    %cst_20 = arith.constant -1.000000e+30 : f32
    %49 = vector.broadcast %cst_20 : f32 to vector<8x8xf32>
    %50 = arith.select %22, %48, %49 : vector<8x8xi1>, vector<8x8xf32>
    %cst_21 = arith.constant dense<0xFF800000> : vector<8xf32>
    %51 = vector.multi_reduction <maximumf>, %50, %cst_21 [1] : vector<8x8xf32> to vector<8xf32>
    %52 = vector.shape_cast %51 : vector<8xf32> to vector<8x1xf32>
    %53 = vector.broadcast %52 : vector<8x1xf32> to vector<8x8xf32>
    %54 = arith.subf %50, %53 : vector<8x8xf32>
    %55 = math.exp %54 : vector<8x8xf32>
    %cst_22 = arith.constant dense<0.000000e+00> : vector<8xf32>
    %56 = vector.multi_reduction <add>, %55, %cst_22 [1] : vector<8x8xf32> to vector<8xf32>
    %57 = vector.shape_cast %56 : vector<8xf32> to vector<8x1xf32>
    %58 = tpu.reciprocal %57 {approx = true} : vector<8x1xf32> -> vector<8x1xf32>
    %59 = vector.broadcast %58 : vector<8x1xf32> to vector<8x8xf32>
    %60 = arith.mulf %55, %59 : vector<8x8xf32>
    %cst_23 = arith.constant dense<0.000000e+00> : vector<8x8xf32>
    %61 = tpu.matmul %60, %47, %cst_23 {dimension_numbers = #tpu.dot_dimension_numbers<[1], [0], [0], [1], [0, 0, 1, 1], [], []>} : vector<8x8xf32>, vector<8x8xf32>, vector<8x8xf32> -> vector<8x8xf32>
    %62 = vector.extract_strided_slice %23 {offsets = [8, 0], sizes = [8, 32], strides = [1, 1]} : vector<32x32xf32> to vector<8x32xf32>
    %cst_24 = arith.constant dense<0.000000e+00> : vector<8x32xf32>
    %63 = tpu.matmul %61, %62, %cst_24 {dimension_numbers = #tpu.dot_dimension_numbers<[1], [0], [0], [1], [0, 0, 1, 1], [], []>} : vector<8x8xf32>, vector<8x32xf32>, vector<8x32xf32> -> vector<8x32xf32>
    %64 = arith.addf %44, %63 : vector<8x32xf32>
    %65 = vector.extract_strided_slice %13 {offsets = [0, 16], sizes = [8, 8], strides = [1, 1]} : vector<8x32xf32> to vector<8x8xf32>
    %66 = vector.extract_strided_slice %18 {offsets = [0, 16], sizes = [8, 8], strides = [1, 1]} : vector<8x32xf32> to vector<8x8xf32>
    %67 = vector.extract_strided_slice %19 {offsets = [0, 16], sizes = [8, 8], strides = [1, 1]} : vector<8x32xf32> to vector<8x8xf32>
    %cst_25 = arith.constant dense<0.000000e+00> : vector<8x8xf32>
    %68 = tpu.matmul %65, %66, %cst_25 {dimension_numbers = #tpu.dot_dimension_numbers<[1], [1], [0], [0], [0, 0, 1, 0], [], []>} : vector<8x8xf32>, vector<8x8xf32>, vector<8x8xf32> -> vector<8x8xf32>
    %cst_26 = arith.constant -1.000000e+30 : f32
    %69 = vector.broadcast %cst_26 : f32 to vector<8x8xf32>
    %70 = arith.select %22, %68, %69 : vector<8x8xi1>, vector<8x8xf32>
    %cst_27 = arith.constant dense<0xFF800000> : vector<8xf32>
    %71 = vector.multi_reduction <maximumf>, %70, %cst_27 [1] : vector<8x8xf32> to vector<8xf32>
    %72 = vector.shape_cast %71 : vector<8xf32> to vector<8x1xf32>
    %73 = vector.broadcast %72 : vector<8x1xf32> to vector<8x8xf32>
    %74 = arith.subf %70, %73 : vector<8x8xf32>
    %75 = math.exp %74 : vector<8x8xf32>
    %cst_28 = arith.constant dense<0.000000e+00> : vector<8xf32>
    %76 = vector.multi_reduction <add>, %75, %cst_28 [1] : vector<8x8xf32> to vector<8xf32>
    %77 = vector.shape_cast %76 : vector<8xf32> to vector<8x1xf32>
    %78 = tpu.reciprocal %77 {approx = true} : vector<8x1xf32> -> vector<8x1xf32>
    %79 = vector.broadcast %78 : vector<8x1xf32> to vector<8x8xf32>
    %80 = arith.mulf %75, %79 : vector<8x8xf32>
    %cst_29 = arith.constant dense<0.000000e+00> : vector<8x8xf32>
    %81 = tpu.matmul %80, %67, %cst_29 {dimension_numbers = #tpu.dot_dimension_numbers<[1], [0], [0], [1], [0, 0, 1, 1], [], []>} : vector<8x8xf32>, vector<8x8xf32>, vector<8x8xf32> -> vector<8x8xf32>
    %82 = vector.extract_strided_slice %23 {offsets = [16, 0], sizes = [8, 32], strides = [1, 1]} : vector<32x32xf32> to vector<8x32xf32>
    %cst_30 = arith.constant dense<0.000000e+00> : vector<8x32xf32>
    %83 = tpu.matmul %81, %82, %cst_30 {dimension_numbers = #tpu.dot_dimension_numbers<[1], [0], [0], [1], [0, 0, 1, 1], [], []>} : vector<8x8xf32>, vector<8x32xf32>, vector<8x32xf32> -> vector<8x32xf32>
    %84 = arith.addf %64, %83 : vector<8x32xf32>
    %85 = vector.extract_strided_slice %13 {offsets = [0, 24], sizes = [8, 8], strides = [1, 1]} : vector<8x32xf32> to vector<8x8xf32>
    %86 = vector.extract_strided_slice %18 {offsets = [0, 24], sizes = [8, 8], strides = [1, 1]} : vector<8x32xf32> to vector<8x8xf32>
    %87 = vector.extract_strided_slice %19 {offsets = [0, 24], sizes = [8, 8], strides = [1, 1]} : vector<8x32xf32> to vector<8x8xf32>
    %cst_31 = arith.constant dense<0.000000e+00> : vector<8x8xf32>
    %88 = tpu.matmul %85, %86, %cst_31 {dimension_numbers = #tpu.dot_dimension_numbers<[1], [1], [0], [0], [0, 0, 1, 0], [], []>} : vector<8x8xf32>, vector<8x8xf32>, vector<8x8xf32> -> vector<8x8xf32>
    %cst_32 = arith.constant -1.000000e+30 : f32
    %89 = vector.broadcast %cst_32 : f32 to vector<8x8xf32>
    %90 = arith.select %22, %88, %89 : vector<8x8xi1>, vector<8x8xf32>
    %cst_33 = arith.constant dense<0xFF800000> : vector<8xf32>
    %91 = vector.multi_reduction <maximumf>, %90, %cst_33 [1] : vector<8x8xf32> to vector<8xf32>
    %92 = vector.shape_cast %91 : vector<8xf32> to vector<8x1xf32>
    %93 = vector.broadcast %92 : vector<8x1xf32> to vector<8x8xf32>
    %94 = arith.subf %90, %93 : vector<8x8xf32>
    %95 = math.exp %94 : vector<8x8xf32>
    %cst_34 = arith.constant dense<0.000000e+00> : vector<8xf32>
    %96 = vector.multi_reduction <add>, %95, %cst_34 [1] : vector<8x8xf32> to vector<8xf32>
    %97 = vector.shape_cast %96 : vector<8xf32> to vector<8x1xf32>
    %98 = tpu.reciprocal %97 {approx = true} : vector<8x1xf32> -> vector<8x1xf32>
    %99 = vector.broadcast %98 : vector<8x1xf32> to vector<8x8xf32>
    %100 = arith.mulf %95, %99 : vector<8x8xf32>
    %cst_35 = arith.constant dense<0.000000e+00> : vector<8x8xf32>
    %101 = tpu.matmul %100, %87, %cst_35 {dimension_numbers = #tpu.dot_dimension_numbers<[1], [0], [0], [1], [0, 0, 1, 1], [], []>} : vector<8x8xf32>, vector<8x8xf32>, vector<8x8xf32> -> vector<8x8xf32>
    %102 = vector.extract_strided_slice %23 {offsets = [24, 0], sizes = [8, 32], strides = [1, 1]} : vector<32x32xf32> to vector<8x32xf32>
    %cst_36 = arith.constant dense<0.000000e+00> : vector<8x32xf32>
    %103 = tpu.matmul %101, %102, %cst_36 {dimension_numbers = #tpu.dot_dimension_numbers<[1], [0], [0], [1], [0, 0, 1, 1], [], []>} : vector<8x8xf32>, vector<8x32xf32>, vector<8x32xf32> -> vector<8x32xf32>
    %104 = arith.addf %84, %103 : vector<8x32xf32>
    %c0_37 = arith.constant 0 : index
    %c0_38 = arith.constant 0 : index
    %105 = vector.load %arg7[%c0_37, %c0_38] : memref<1x32xf32, #tpu.memory_space<vmem>>, vector<1x32xf32>
    %106 = vector.broadcast %105 : vector<1x32xf32> to vector<8x32xf32>
    %107 = arith.addf %104, %106 : vector<8x32xf32>
    %c0_39 = arith.constant 0 : index
    %c0_40 = arith.constant 0 : index
    %c0_41 = arith.constant 0 : index
    %108 = vector.load %arg8[%c0_39, %c0_40, %c0_41] : memref<1x8x32xf32, #tpu.memory_space<vmem>>, vector<1x8x32xf32>
    %109 = vector.shape_cast %108 : vector<1x8x32xf32> to vector<8x32xf32>
    %110 = vector.shape_cast %107 : vector<8x32xf32> to vector<1x8x32xf32>
    tpu.vector_store %arg8[%c0_39, %c0_40, %c0_41], %110 {strides = array<i32>} : memref<1x8x32xf32, #tpu.memory_space<vmem>>, vector<1x8x32xf32>,
    return
  }
  func.func @transform_0(%arg0: i32) -> (i32, i32, i32) {
    %c0_i32 = arith.constant 0 : i32
    %c0_i32_0 = arith.constant 0 : i32
    %c0_i32_1 = arith.constant 0 : i32
    return %arg0, %c0_i32, %c0_i32_0 : i32, i32, i32
  }
  func.func @transform_1(%arg0: i32) -> (i32, i32) {
    %c0_i32 = arith.constant 0 : i32
    %c0_i32_0 = arith.constant 0 : i32
    %c0_i32_1 = arith.constant 0 : i32
    return %c0_i32, %c0_i32_0 : i32, i32
  }
  func.func @transform_2(%arg0: i32) -> (i32, i32) {
    %c0_i32 = arith.constant 0 : i32
    %c0_i32_0 = arith.constant 0 : i32
    %c0_i32_1 = arith.constant 0 : i32
    return %c0_i32, %c0_i32_0 : i32, i32
  }
  func.func @transform_3(%arg0: i32) -> (i32, i32) {
    %c0_i32 = arith.constant 0 : i32
    %c0_i32_0 = arith.constant 0 : i32
    %c0_i32_1 = arith.constant 0 : i32
    return %c0_i32, %c0_i32_0 : i32, i32
  }
  func.func @transform_4(%arg0: i32) -> (i32, i32) {
    %c0_i32 = arith.constant 0 : i32
    %c0_i32_0 = arith.constant 0 : i32
    %c0_i32_1 = arith.constant 0 : i32
    return %c0_i32, %c0_i32_0 : i32, i32
  }
  func.func @transform_5(%arg0: i32) -> (i32, i32) {
    %c0_i32 = arith.constant 0 : i32
    %c0_i32_0 = arith.constant 0 : i32
    %c0_i32_1 = arith.constant 0 : i32
    return %c0_i32, %c0_i32_0 : i32, i32
  }
  func.func @transform_6(%arg0: i32) -> (i32, i32) {
    %c0_i32 = arith.constant 0 : i32
    %c0_i32_0 = arith.constant 0 : i32
    %c0_i32_1 = arith.constant 0 : i32
    return %c0_i32, %c0_i32_0 : i32, i32
  }
  func.func @transform_7(%arg0: i32) -> (i32, i32, i32) {
    %c0_i32 = arith.constant 0 : i32
    %c0_i32_0 = arith.constant 0 : i32
    %c0_i32_1 = arith.constant 0 : i32
    return %arg0, %c0_i32, %c0_i32_0 : i32, i32, i32
  }
}

</mosaic_0001>

<bundles_post_ra>
// kernel: tile.14
= control target key start
LH: loop header
LB: loop body
LE: loop exit
PB: predicated region body
PF: predicated region fallthrough
CT: control target
= control target key end

     0   :  { %vm42_vm0 = vcmask 1047556   ;;  %vm44_vm1 = vcmask 64512   ;;  %s93_s22 = smov 8   ;;  %s94_s25 = smov 16   ;;  %vm54_vm2 = vcmask 261312   ;;  %vm64_vm3 = vcmask 195712   ;;  %s146_s0 = inlined_call_operand.vmem [shape: f32[8,4,8], index: 0, kind: input, shape index: {}]   ;;  %s147_s1 = inlined_call_operand.vmem [shape: f32[8,32], index: 1, kind: output, shape index: {}]  }
   0x1   :  { %v82_v0 = vld [vmem:[%s146_s0 + $0x1c] sm:$0xf]  ;;  %v83_v1 = vld [vmem:[%s146_s0 + $0x18] sm:$0xf]  ;;  %v84_v2 = vld [vmem:[%s146_s0 + $0x14] sm:$0xf] }
   0x2   :  { %8 = vst [vmem:[#allocation0 + $0x38] sm:$0xf] %v82_v0  ;;  %13 = vst [vmem:[#allocation0 + $0x30] sm:$0xf] %v83_v1  ;;  %v85_v3 = vld [vmem:[%s146_s0 + $0x10] sm:$0xf] }
   0x3   :  { %18 = vst [vmem:[#allocation0 + $0x28] sm:$0xf] %v84_v2  ;;  %v86_v4 = vld [vmem:[%s146_s0 + $0xc] sm:$0xf]  ;;  %v87_v5 = vld [vmem:[%s146_s0 + $0x8] sm:$0xf] }
   0x4   :  { %23 = vst [vmem:[#allocation0 + $0x20] sm:$0xf] %v85_v3  ;;  %28 = vst [vmem:[#allocation0 + $0x18] sm:$0xf] %v86_v4  ;;  %v88_v6 = vld [vmem:[%s146_s0 + $0x4] sm:$0xf] }
   0x5   :  { %33 = vst [vmem:[#allocation0 + $0x10] sm:$0xf] %v87_v5  ;;  %v38_v7 = vld [vmem:[%s146_s0] sm:$0xf]  ;;  %37 = vst [vmem:[#allocation0 + $0x8] sm:$0xf] %v88_v6 }
   0x6   :  { %39 = vst [vmem:[#allocation0] sm:$0xf] %v38_v7  ;;  %s92_s0 = smov 24   ;;  %vm74_vm4 = vcmask 130112  }
   0xb   :  { %v49_v8 = vld [vmem:[#allocation0 + $0x3] ss:$8 sm:$0xf0]   ;;  %v59_v9 = vld [vmem:[#allocation0 + $0x2] ss:$8 sm:$0xf0]  }
   0xc   :  { %v69_v14 = vld [vmem:[#allocation0 + $0x1] ss:$8 sm:$0xf0]   ;;  %v41_v17 = vld [vmem:[#allocation0] ss:$8 sm:$0xf0]  }
   0xd   :  { %v47_v10 = vld [vmem:[#allocation0 + $0x3] ss:$8 sm:$0xf]   ;;  %v57_v11 = vld [vmem:[#allocation0 + $0x2] ss:$8 sm:$0xf]  }
   0xe   :  { %v51_v12 = vsel %vm42_vm0, %v49_v8, %v47_v10  ;;  %v67_v13 = vld [vmem:[#allocation0 + $0x1] ss:$8 sm:$0xf]   ;;  %v40_v16 = vld [vmem:[#allocation0] ss:$8 sm:$0xf]   ;;  %v61_v18 = vsel %vm42_vm0, %v59_v9, %v57_v11 }
   0xf   :  { %52 = vrot.lane.b32.xlu0 %v51_v12, %s92_s0  ;;  %v71_v15 = vsel %vm42_vm0, %v69_v14, %v67_v13  ;;  %v43_v19 = vsel %vm42_vm0, %v41_v17, %v40_v16 }
  0x10   :  { %72 = vrot.lane.b32.xlu1 %v71_v15, %s93_s22  ;;  %45 = vst.msk [vmem:[%s147_s1] sm:$0xff] %vm44_vm1, %v43_v19  }
  0x13   :  { %62 = vrot.lane.b32.xlu0 %v61_v18, %s94_s25 }
  0x81   :  { %v53_v20 = vpop.permute.xlu0 %52  }
  0x82   :  { %55 = vst.msk [vmem:[%s147_s1] sm:$0xff] %vm54_vm2, %v53_v20   ;;  %v73_v21 = vpop.permute.xlu1 %72  }
  0x85   :  { %v63_v22 = vpop.permute.xlu0 %62  }
  0x86   :  { %65 = vst.msk [vmem:[%s147_s1] sm:$0xff] %vm64_vm3, %v63_v22  }
  0x87   :  { %75 = vst.msk [vmem:[%s147_s1] sm:$0xff] %vm74_vm4, %v73_v21  }

// kernel: mha_rotary_forward.1
= control target key start
LH: loop header
LB: loop body
LE: loop exit
PB: predicated region body
PF: predicated region fallthrough
CT: control target
= control target key end

     0   :  { %12 = vsyncpa [#allocation3], 0  ;;  %s2007_s0 = inlined_call_operand.vmem [shape: f32[2,8,32], index: 0, kind: input, shape index: {}]   ;;  %s2008_s1 = inlined_call_operand.vmem [shape: f32[32,160], index: 1, kind: input, shape index: {}]   ;;  %s2009_s2 = inlined_call_operand.vmem [shape: f32[1,160], index: 2, kind: input, shape index: {}]   ;;  %s2010_s3 = inlined_call_operand.vmem [shape: f32[8,32], index: 3, kind: input, shape index: {}]   ;;  %s2011_s4 = inlined_call_operand.vmem [shape: f32[8,32], index: 4, kind: input, shape index: {}]   ;;  %s2012_s5 = inlined_call_operand.vmem [shape: f32[32,32], index: 5, kind: input, shape index: {}]   ;;  %s2013_s6 = inlined_call_operand.vmem [shape: f32[1,32], index: 6, kind: input, shape index: {}]   ;;  %s2014_s7 = inlined_call_operand.hbm [shape: f32[2,8,32], index: 7, kind: output, shape index: {}]  }
   0x1   :  { %14 = vsyncpa [#allocation3 + $0x1], 0  ;;  %s1753_s24 = smov 0   ;;  %s1755_s25 = smov 0  }
   0x2   :  { %s1757_s26 = smov 0   ;;  %s1759_s27 = smov 0  }
   0x3 LB: > { %s1774_s28 = sadd.s32 4294967295, %s1696_s27   ;;  %s1445_s29 = sadd.s32 4294967294, %s1696_s27   ;;  %s1696_s27 = sphi %s1759_s27, %s2020_s27   ;;  %s1692_s26 = sphi %s1757_s26, %s2019_s26   ;;  %s1688_s25 = sphi %s1755_s25, %s2018_s25   ;;  %s1684_s24 = sphi %s1753_s24, %s2017_s24  }
   0x4   : > { %s1778_s30 = sadd.s32 1, %s1696_s27   ;;  %s179_s8 = sadd.s32 1, %s1692_s26 }
   0x5   : > { %s176_s9 = ssub.s32 %s1696_s27, %s1778_s30  ;;  %p189_p0 = scmp.ne.s32.totalorder %s1692_s26, %s1688_s25 }
   0x6   : > { %p177_p1 = scmp.eq.s32.totalorder %s176_s9, 0  ;;  %p190_p2 = scmp.eq.s32.totalorder %s1774_s28, 1 }
   0x7   : > { %p195_p3 = scmp.ne.s32.totalorder %s1688_s25, %s1684_s24  ;;  %p196_p4 = scmp.eq.s32.totalorder %s1445_s29, 1 }
   0x8   : > { %s1789_s10 = scalar_select %p177_p1, %s1692_s26, %s179_s8  }
   0x9   : > { %p1791_p5 = por %p190_p2, %p189_p0  ;;  %p1795_p6 = por %p196_p4, %p195_p3 }
   0xa   : > { %p1448_p7 = scmp.ge.s32.totalorder %s1696_s27, 1  ;;  %p239_p8 = scmp.lt.s32.totalorder %s1696_s27, 3 }
   0xc   : > { %p240_p9 = pnand %p1448_p7, %p239_p8 }
   0xd   : > { %v276_v0 = vld [vmem:[%s2008_s1 + $0x8] sm:$0xff] (!%p240_p9)  ;;  %v278_v1 = vld [vmem:[%s2008_s1 + $0x18] sm:$0xff] (!%p240_p9)  ;;  %v275_v2 = vld [vmem:[%s2008_s1] sm:$0xff] (!%p240_p9)  ;;  %p270_p10 = scmp.lt.s32.totalorder (!%p240_p9), %s1774_s28, 1  ;;  %v1698_v7 = vmov (!%p240_p9), 0.0   ;;  %s1699_s18 = smov (!%p240_p9), 96   ;;  %v285_v16 = vlaneseq (!%p240_p9) }
   0xe   : > { %243 = sbr.rel (%p240_p9) target bundleno = 2725 (0xaa5), region = 48  ;;  %v1557_v3 = vpack.c.bf16 (!%p240_p9), %v278_v1, %v276_v0  ;;  %v277_v4 = vld [vmem:[%s2008_s1 + $0x10] sm:$0xff] (!%p240_p9)  ;;  %v280_v5 = vld [vmem:[%s2008_s1 + $0x28] sm:$0xff] (!%p240_p9)  ;;  %v282_v6 = vld [vmem:[%s2008_s1 + $0x38] sm:$0xff] (!%p240_p9)  ;;  %363 = vmatprep.mubr.f32.mxu0 (!%p240_p9), %v1698_v7  ;;  %1497 = vmatprep.subr.mxu1 (!%p240_p9), %v1698_v7  ;;  %s1700_s8 = smov (!%p240_p9), 32   ;;  %vm295_vm0 = vcmask (!%p240_p9), 261120  }
   0xf   : > { %v1559_v8 = vpack.c.bf16 (!%p240_p9), %v277_v4, %v275_v2  ;;  %v1561_v9 = vpack.c.bf16 (!%p240_p9), %v282_v6, %v280_v5  ;;  %v279_v10 = vld [vmem:[%s2008_s1 + $0x20] sm:$0xff] (!%p240_p9)  ;;  %v281_v11 = vld [vmem:[%s2008_s1 + $0x30] sm:$0xff] (!%p240_p9)  ;;  %v1841_v17 = vshrl.u32 (!%p240_p9), %v285_v16, 7  ;;  %vm1701_vm1 = vmmov (!%p240_p9), 0   ;;  %s1702_s14 = smov (!%p240_p9), 88   ;;  %s1704_s16 = smov (!%p240_p9), 56  }
  0x10   : > { %v371_v12 = vld [vmem:[%s2011_s4] sm:$0xff] (!%p240_p9)  ;;  %1558 = vmatprep.subr.bf16.mxu0 (!%p240_p9), %v1557_v3  ;;  %v1563_v13 = vpack.c.bf16 (!%p240_p9), %v281_v11, %v279_v10  ;;  %1499 = vmatprep.mubr.msk.f32.mxu1 (!%p240_p9), %vm1701_vm1, %v1698_v7  ;;  %vm406_vm2 = vcmask (!%p240_p9), 64512   ;;  %v1876_v40 = vand.u32 (!%p240_p9), 127, %v285_v16  ;;  %s1705_s17 = smov (!%p240_p9), 80   ;;  %v400_v59 = vld [vmem:[%s2012_s5 + $0x8] sm:$0xff] (!%p240_p9)  ;;  %s1710_s9 = smov (!%p240_p9), 48  }
  0x11   : > { %374 = vrot.lane.b32.xlu0 (!%p240_p9), %v371_v12, %s1699_s18  ;;  %1560 = vmatpush1.bf16.msra.mxu0 (!%p240_p9), %v1559_v8  ;;  %v370_v14 = vld [vmem:[%s2010_s3] sm:$0xff] (!%p240_p9)  ;;  %v291_v18 = vsub.s32 (!%p240_p9), 1, %v1841_v17  ;;  %v287_v20 = vsub.s32 (!%p240_p9), 0, %v1841_v17  ;;  %s1470_s22 = sshll.u32 (!%p240_p9), %s1774_s28, 7 }
  0x12   : > { %1562 = vmatprep.subr.bf16.mxu0 (!%p240_p9), %v1561_v9  ;;  %v283_v19 = vld [vmem:[%s2009_s2] sm:$0x3] (!%p240_p9)  ;;  %vm398_vm3 = vcmp.ge.s32.totalorder (!%p240_p9), %v1841_v17, %v1876_v40  ;;  %v402_v17 = vld [vmem:[%s2012_s5 + $0x18] sm:$0xff] (!%p240_p9)  ;;  %s1964_s13 = scalar_lea.hbm (!%p240_p9), %s2014_s7, %s1470_s22 }
  0x13   : > { %v292_v21 = vrot.slane (!%p240_p9), %v283_v19, %v291_v18  ;;  %v288_v22 = vrot.slane (!%p240_p9), %v283_v19, %v287_v20  ;;  %v399_v4 = vld [vmem:[%s2012_s5] sm:$0xff] (!%p240_p9) }
  0x15   : > { %s271_s15 = scalar_select %p270_p10, %s1774_s28, 1  ;;  %384 = vrot.lane.b32.xlu0 %v370_v14, %s1700_s8  ;;  %1564 = vmatpush1.bf16.msra.mxu0 %v1563_v13 }
  0x16   : > { %1507 = vmatprep.subr.mxu0 %v1698_v7  ;;  %s1712_s28 = smov [#allocation2]  }
  0x17   : > { %s1450_s19 = sshll.u32 %s271_s15, 3  ;;  %s1703_s15 = smov 120  }
  0x18   : > { %s273_s29 = scalar_lea.vmem %s2007_s0, %s1450_s19  ;;  %s1707_s19 = smov 112  }
  0x19   : > { %v274_v15 = vld [vmem:[%s273_s29] sm:$0xff]  ;;  %s1708_s29 = smov 72  }
  0x1a   : > { %1451 = vmatmul.mubr.msk.f32.vlgmr.msra.gmra.mrb[0].mxu0 %vm295_vm0, %v274_v15 }
  0x1b   : > { %1509 = vmatprep.mubr.msk.f32.mxu0 %vm1701_vm1, %v1698_v7 }
  0x83   : > { %v375_v28 = vpop.permute.xlu0 %374 }
  0x87   : > { %v385_v30 = vpop.permute.xlu0 %384 }
  0xed   : > { %v365_v23 = vpop.f32.mrb[0].mxu0 }
  0xee   : > { %v367_v24 = vpop.f32.mrb[1].mxu0  ;;  %v1848_v26 = vadd.f32 %v365_v23, %v288_v22 }
  0xef   : > { %v368_v25 = vadd.f32 %v367_v24, %v292_v21 }
  0xf0   : > { %v377_v29 = vmul.f32 %v375_v28, %v1848_v26  ;;  %v387_v31 = vmul.f32 %v385_v30, %v1848_v26  ;;  %v372_v34 = vmul.f32 %v370_v14, %v1848_v26 }
  0xf1   : > { %v388_v27 = vmul.f32 %v371_v12, %v368_v25 }
  0xf3   : > { %390 = vrot.lane.b32.xlu1 %v388_v27, %s1700_s8 }
  0xf7   : > { %379 = vrot.lane.b32.xlu1 %v377_v29, %s1700_s8  ;;  %s1709_s8 = smov 104  }
 0x165   : > { %v391_v32 = vpop.permute.xlu1 %390 }
 0x166   : > { %v1856_v33 = vadd.f32 %v391_v32, %v387_v31 }
 0x168   : > { %404 = vrot.lane.b32.xlu0 %v1856_v33, %s1699_s18  ;;  %573 = vrot.lane.b32.xlu1 %v1856_v33, %s1702_s14  ;;  %s1706_s18 = smov 64  }
 0x169   : > { %v380_v35 = vpop.permute.xlu1 %379 }
 0x16a   : > { %v1862_v36 = vadd.f32 %v380_v35, %v372_v34  ;;  %v401_v34 = vld [vmem:[%s2012_s5 + $0x10] sm:$0xff] }
 0x16c   : > { %571 = vrot.lane.b32.xlu0 %v1862_v36, %s1703_s15  ;;  %s1711_s15 = smov 40  }
 0x1da   : > { %v405_v37 = vpop.permute.xlu0 %404  ;;  %v574_v38 = vpop.permute.xlu1 %573 }
 0x1db   : > { %1498 = vmatpush3.xpose.msk.msra.mxu1 %vm406_vm2, %v405_v37  ;;  %1508 = vmatpush3.xpose.msk.msra.mxu0 %vm406_vm2, %v574_v38 }
 0x1dc   : > { %1502 = vmatprep.subr.mxu1 %v1698_v7  ;;  %1517 = vmatprep.subr.mxu0 %v1698_v7 }
 0x1de   : > { %v572_v39 = vpop.permute.xlu0 %571  ;;  %1500 = vmatmul.mubr.msk.f32.vlgmr.msra.gmra.mrb[0].mxu1 %vm406_vm2, %v1862_v36 }
 0x1df   : > { %1510 = vmatmul.mubr.msk.f32.vlgmr.msra.gmra.mrb[2].mxu0 %vm406_vm2, %v572_v39  ;;  %1504 = vmatprep.mubr.msk.f32.mxu1 %vm1701_vm1, %v1698_v7 }
 0x1e0   : > { %1519 = vmatprep.mubr.msk.f32.mxu0 %vm1701_vm1, %v1698_v7  ;;  %1518 = vmatpush3.msra.mxu0 %v400_v59 }
 0x1e1   : > { %1527 = vmatprep.subr.mxu0 %v1698_v7 }
 0x2b1   : > { %v478_v41 = vpop.f32.mrb[0].mxu1 }
 0x2b2   : > { %v482_v42 = vsel %vm398_vm3, %v478_v41, -1e+30  ;;  %v1501_v43 = vpop.f32.mrb[1].mxu1  ;;  %v645_v44 = vpop.f32.mrb[2].mxu0 }
 0x2b3   : > { %v649_v45 = vsel %vm398_vm3, %v645_v44, -1e+30  ;;  %v1511_v46 = vpop.f32.mrb[3].mxu0  ;;  %v483_v47 = vsel %vm406_vm2, %v482_v42, -inf }
 0x2b4   : > { %484 = vmax.xlane.f32.xlu1 %v483_v47  ;;  %v650_v48 = vsel %vm406_vm2, %v649_v45, -inf }
 0x2b5   : > { %651 = vmax.xlane.f32.xlu0 %v650_v48 }
 0x341   : > { %v485_v49 = vpop.xlane.xlu1 %484 }
 0x342   : > { %v486_v50 = vsub.f32 %v482_v42, %v485_v49  ;;  %v652_v51 = vpop.xlane.xlu0 %651 }
 0x343   : > { %v653_v52 = vsub.f32 %v649_v45, %v652_v51 }
 0x344   : > { %v487_v53 = vmul.f32 1.442695, %v486_v50 }
 0x345   : > { %v654_v54 = vmul.f32 1.442695, %v653_v52 }
 0x346   : > { %1618 = vpow2.f32 %v487_v53 }
 0x347   : > { %1620 = vpow2.f32 %v654_v54  ;;  %v1468_v54 = vld [vmem:[%s2013_s6] ss:$0 sm:$0xff] }
 0x350   : > { %v1619_v55 = vpop.eup %1618 }
 0x351   : > { %v1621_v56 = vpop.eup %1620  ;;  %v489_v57 = vsel %vm406_vm2, %v1619_v55, 0.0 }
 0x352   : > { %490 = vadd.xlane.f32.xlu0 %v489_v57  ;;  %v656_v58 = vsel %vm406_vm2, %v1621_v56, 0.0 }
 0x353   : > { %657 = vadd.xlane.f32.xlu1 %v656_v58 }
 0x364   : > { %661 = vrot.lane.b32.xlu1 %v1848_v26, %s1704_s16  ;;  %s1638_s16 = sshll.u32 %s1712_s28, 4  ;;  %s1639_s16 = int_to_ptr.vmem [resolvable:$false] %s1638_s16 }
 0x368   : > { %885 = vrot.lane.b32.xlu1 %v1856_v33, %s1705_s17  ;;  %495 = vrot.lane.b32.xlu0 %v1848_v26, %s1706_s18  ;;  %s267_s18 = sand.u32 1, %s1688_s25   ;;  %s1640_s17 = scalar_lea.vmem %s1639_s16, 256 }
 0x369   : > { %s1373_s14 = scalar_lea.sflag [#allocation3], %s267_s18 }
 0x36c   : > { %883 = vrot.lane.b32.xlu0 %v1862_v36, %s1707_s19  ;;  %s1449_s19 = sshll.u32 %s267_s18, 3 }
 0x36d   : > { %s269_s23 = scalar_lea.vmem [#allocation2], %s1449_s19 }
 0x3df   : > { %v491_v60 = vpop.xlane.xlu0 %490 }
 0x3e0   : > { %1622 = vrcp.f32 %v491_v60  ;;  %v658_v61 = vpop.xlane.xlu1 %657 }
 0x3e1   : > { %1624 = vrcp.f32 %v658_v61 }
 0x3e3   : > { %v496_v62 = vpop.permute.xlu0 %495 }
 0x3e4   : > { %1503 = vmatpush3.msra.mxu1 %v496_v62  ;;  %v662_v2 = vpop.permute.xlu1 %661 }
 0x3e5   : > { %1512 = vmatprep.subr.mxu1 %v1698_v7 }
 0x3e7   : > { %v884_v11 = vpop.permute.xlu0 %883 }
 0x3e8   : > { %v886_v9 = vpop.permute.xlu1 %885 }
 0x3ea   : > { %v1623_v63 = vpop.eup %1622 }
 0x3eb   : > { %v493_v0 = vmul.f32 %v1623_v63, %v1619_v55  ;;  %v1625_v1 = vpop.eup %1624 }
 0x3ec   : > { %v660_v3 = vmul.f32 %v1625_v1, %v1621_v56 }
 0x3ed   : > { %1505 = vmatmul.mubr.msk.f32.vlgmr.msra.gmra.mrb[2].mxu1 %vm406_vm2, %v493_v0 }
 0x3ee   : > { %1513 = vmatpush3.msra.mxu1 %v662_v2  ;;  %1514 = vmatprep.mubr.msk.f32.mxu1 %vm1701_vm1, %v1698_v7 }
 0x3ef   : > { %1522 = vmatprep.subr.mxu1 %v1698_v7 }
 0x3f1   : > { %1515 = vmatmul.mubr.msk.f32.vlgmr.msra.gmra.mrb[4].mxu1 %vm406_vm2, %v660_v3 }
 0x3f2   : > { %1524 = vmatprep.mubr.msk.f32.mxu1 %vm1701_vm1, %v1698_v7  ;;  %1523 = vmatpush3.msra.mxu1 %v399_v4 }
 0x3f3   : > { %1532 = vmatprep.subr.mxu1 %v1698_v7 }
 0x4c0   : > { %v567_v5 = vpop.f32.mrb[2].mxu1 }
 0x4c1   : > { %v1506_v6 = vpop.f32.mrb[3].mxu1  ;;  %1525 = vmatmul.mubr.msk.f32.vlgmr.msra.gmra.mrb[6].mxu1 %vm406_vm2, %v567_v5 }
 0x4c2   : > { %1534 = vmatprep.mubr.msk.f32.mxu1 %vm1701_vm1, %v1698_v7 }
 0x4c4   : > { %v733_v8 = vpop.f32.mrb[4].mxu1 }
 0x4c5   : > { %v1516_v10 = vpop.f32.mrb[5].mxu1  ;;  %1520 = vmatmul.mubr.msk.f32.vlgmr.msra.gmra.mrb[4].mxu0 %vm406_vm2, %v733_v8 }
 0x4c6   : > { %1528 = vmatpush3.xpose.msk.msra.mxu0 %vm406_vm2, %v886_v9  ;;  %1529 = vmatprep.mubr.msk.f32.mxu0 %vm1701_vm1, %v1698_v7 }
 0x4c7   : > { %1537 = vmatprep.subr.mxu0 %v1698_v7 }
 0x4c9   : > { %1530 = vmatmul.mubr.msk.f32.vlgmr.msra.gmra.mrb[6].mxu0 %vm406_vm2, %v884_v11 }
 0x4ca   : > { %1539 = vmatprep.mubr.msk.f32.mxu0 %vm1701_vm1, %v1698_v7  ;;  %1538 = vmatpush3.msra.mxu0 %v401_v34 }
 0x4cb   : > { %1547 = vmatprep.subr.mxu0 %v1698_v7 }
 0x594   : > { %v879_v12 = vpop.f32.mrb[6].mxu1 }
 0x595   : > { %v1526_v13 = vpop.f32.mrb[7].mxu1 }
 0x598   : > { %v806_v14 = vpop.f32.mrb[4].mxu0 }
 0x599   : > { %v880_v15 = vadd.f32 %v879_v12, %v806_v14  ;;  %v1521_v16 = vpop.f32.mrb[5].mxu0 }
 0x59c   : > { %v957_v18 = vpop.f32.mrb[6].mxu0 }
 0x59d   : > { %v961_v19 = vsel %vm398_vm3, %v957_v18, -1e+30  ;;  %v1531_v20 = vpop.f32.mrb[7].mxu0 }
 0x59e   : > { %v962_v21 = vsel %vm406_vm2, %v961_v19, -inf }
 0x59f   : > { %963 = vmax.xlane.f32.xlu1 %v962_v21 }
 0x5b0   : > { %1125 = vrot.lane.b32.xlu1 %v1856_v33, %s1708_s29  ;;  %s1386_s29 = sshll.u32 %s269_s23, 4  ;;  %s1966_s29 = int_to_ptr.vmem [resolvable:$true] %s1386_s29 }
 0x5b1   : > { %p1641_p0 = scmp.lt.s32.totalorder %s1966_s29, %s1639_s16 }
 0x5b4   : > { %1123 = vrot.lane.b32.xlu1 %v1862_v36, %s1709_s8 }
 0x62c   : > { %v964_v22 = vpop.xlane.xlu1 %963 }
 0x62d   : > { %v965_v23 = vsub.f32 %v961_v19, %v964_v22 }
 0x62f   : > { %v966_v24 = vmul.f32 1.442695, %v965_v23 }
 0x630   : > { %v1126_v31 = vpop.permute.xlu1 %1125 }
 0x631   : > { %1626 = vpow2.f32 %v966_v24 }
 0x634   : > { %v1124_v33 = vpop.permute.xlu1 %1123 }
 0x63b   : > { %v1627_v25 = vpop.eup %1626 }
 0x63c   : > { %v968_v27 = vsel %vm406_vm2, %v1627_v25, 0.0 }
 0x63d   : > { %969 = vadd.xlane.f32.xlu0 %v968_v27 }
 0x653   : > { %973 = vrot.lane.b32.xlu0 %v1848_v26, %s1710_s9 }
 0x6ca   : > { %v970_v28 = vpop.xlane.xlu0 %969 }
 0x6cb   : > { %1628 = vrcp.f32 %v970_v28 }
 0x6ce   : > { %v974_v29 = vpop.permute.xlu0 %973 }
 0x6cf   : > { %1533 = vmatpush3.msra.mxu1 %v974_v29 }
 0x6d0   : > { %1542 = vmatprep.subr.mxu1 %v1698_v7 }
 0x6d5   : > { %v1629_v30 = vpop.eup %1628 }
 0x6d6   : > { %v972_v32 = vmul.f32 %v1629_v30, %v1627_v25 }
 0x6d8   : > { %1535 = vmatmul.mubr.msk.f32.vlgmr.msra.gmra.mrb[8].mxu1 %vm406_vm2, %v972_v32 }
 0x6d9   : > { %1543 = vmatpush3.xpose.msk.msra.mxu1 %vm406_vm2, %v1126_v31  ;;  %1544 = vmatprep.mubr.msk.f32.mxu1 %vm1701_vm1, %v1698_v7 }
 0x6da   : > { %1552 = vmatprep.subr.mxu1 %v1698_v7 }
 0x6dc   : > { %1545 = vmatmul.mubr.msk.f32.vlgmr.msra.gmra.mrb[10].mxu1 %vm406_vm2, %v1124_v33 }
 0x6dd   : > { %1554 = vmatprep.mubr.msk.f32.mxu1 %vm1701_vm1, %v1698_v7  ;;  %1553 = vmatpush3.msra.mxu1 %v402_v17 }
 0x7ab   : > { %v1045_v35 = vpop.f32.mrb[8].mxu1 }
 0x7ac   : > { %v1536_v36 = vpop.f32.mrb[9].mxu1  ;;  %1540 = vmatmul.mubr.msk.f32.vlgmr.msra.gmra.mrb[8].mxu0 %vm406_vm2, %v1045_v35 }
 0x7ad   : > { %1549 = vmatprep.mubr.msk.f32.mxu0 %vm1701_vm1, %v1698_v7 }
 0x7af   : > { %v1197_v37 = vpop.f32.mrb[10].mxu1 }
 0x7b0   : > { %v1201_v38 = vsel %vm398_vm3, %v1197_v37, -1e+30  ;;  %v1546_v39 = vpop.f32.mrb[11].mxu1 }
 0x7b1   : > { %v1202_v41 = vsel %vm406_vm2, %v1201_v38, -inf }
 0x7b2   : > { %1203 = vmax.xlane.f32.xlu0 %v1202_v41 }
 0x7c8   : > { %1213 = vrot.lane.b32.xlu0 %v1848_v26, %s1711_s15  ;;  %s1634_s15 = scalar_lea.vmem %s1966_s29, 128 }
 0x7c9   : > { %p1635_p11 = scmp.ne.s32.totalorder %s1966_s29, %s1634_s15  ;;  %p1642_p1 = scmp.lt.s32.totalorder %s1640_s17, %s1634_s15 }
 0x7cb   : > { %p1636_p12 = pnand %p1635_p11, %p1791_p5  ;;  %p1643_p2 = por %p1642_p1, %p1641_p0 }
 0x7cd   : > { %p1637_p13 = pneg %p1636_p12 }
 0x7cf   : > { %p1644_p3 = pnand %p1643_p2, %p1637_p13 }
 0x83f   : > { %v1204_v42 = vpop.xlane.xlu0 %1203 }
 0x840   : > { %v1205_v43 = vsub.f32 %v1201_v38, %v1204_v42 }
 0x842   : > { %v1206_v44 = vmul.f32 1.442695, %v1205_v43 }
 0x843   : > { %v1214_v45 = vpop.permute.xlu0 %1213 }
 0x844   : > { %1630 = vpow2.f32 %v1206_v44  ;;  %1548 = vmatpush3.msra.mxu0 %v1214_v45 }
 0x84e   : > { %v1631_v46 = vpop.eup %1630 }
 0x84f   : > { %v1208_v7 = vsel %vm406_vm2, %v1631_v46, 0.0 }
 0x850   : > { %1209 = vadd.xlane.f32.xlu1 %v1208_v7 }
 0x87f   : > { %v1118_v40 = vpop.f32.mrb[8].mxu0 }
 0x880   : > { %v1122_v47 = vadd.f32 %v1118_v40, %v880_v15  ;;  %v1541_v26 = vpop.f32.mrb[9].mxu0 }
 0x8dd   : > { %v1210_v48 = vpop.xlane.xlu1 %1209 }
 0x8de   : > { %1632 = vrcp.f32 %v1210_v48 }
 0x8e8   : > { %v1633_v49 = vpop.eup %1632 }
 0x8e9   : > { %v1212_v50 = vmul.f32 %v1633_v49, %v1631_v46 }
 0x8eb   : > { %1550 = vmatmul.mubr.msk.f32.vlgmr.msra.gmra.mrb[10].mxu0 %vm406_vm2, %v1212_v50 }
 0x9be   : > { %v1285_v51 = vpop.f32.mrb[10].mxu0 }
 0x9bf   : > { %v1551_v52 = vpop.f32.mrb[11].mxu0  ;;  %1555 = vmatmul.mubr.msk.f32.vlgmr.msra.gmra.mrb[12].mxu1 %vm406_vm2, %v1285_v51 }
 0xa92   : > { %v1358_v53 = vpop.f32.mrb[12].mxu1 }
 0xa93   : > { %v1362_v55 = vadd.f32 %v1358_v53, %v1122_v47  ;;  %v1556_v56 = vpop.f32.mrb[13].mxu1 }
 0xa95   : > { %v1370_v57 = vadd.f32 %v1468_v54, %v1362_v55 }
 0xa97   : > { %1371 = vst.msk [vmem:[%s269_s23] sm:$0xff] %vm295_vm0, %v1370_v57 }
 0xa98   : > { %1647 = shalt.err (!%p1644_p3)
}
 0xa99   : > { %s1648_s18 = scalar_lea.hbm %s1964_s13, 128  ;;  %s1652_s21 = scalar_lea.hbm %s2014_s7, 256 }
 0xa9a   : > { %p1649_p4 = scmp.ne.s32.totalorder %s1964_s13, %s1648_s18  ;;  %p1653_p9 = scmp.lt.u32.totalorder %s1964_s13, %s2014_s7 }
 0xa9b   : > { %p1654_p10 = scmp.lt.u32.totalorder %s1652_s21, %s1648_s18  ;;  %p1656_p12 = scmp.lt.u32.totalorder %s1648_s18, %s1964_s13 }
 0xa9c   : > { %p1650_p7 = pnand %p1649_p4, %p1791_p5 }
 0xa9d   : > { %p1655_p11 = por %p1654_p10, %p1653_p9 }
 0xa9e   : > { %p1651_p8 = pneg %p1650_p7 }
 0xa9f   : > { %p1657_p13 = por %p1656_p12, %p1655_p11 }
 0xaa1   : > { %p1658_p0 = pnand %p1657_p13, %p1651_p8 }
 0xaa3   : > { %1661 = shalt.err (!%p1658_p0)
}
 0xaa4   : > { %1565 = dma.vmem_to_hbm [thread:$0]  (%p1791_p5), %s1966_s29, 128, %s1964_s13, %s1373_s14  }
 0xaa5 PF: > { %p1571_p1 = scmp.ge.s32.totalorder %s1696_s27, 2  ;;  %s1398_s8 = sand.u32 1, %s1684_s24  }
 0xaa6   : > { %s1399_s9 = scalar_lea.sflag [#allocation3], %s1398_s8 }
 0xaa7   : > { %p1568_p2 = pnand %p1571_p1, %p1795_p6 }
 0xaa9   : > { %1679 = dma.done.wait (!%p1568_p2), %s1399_s9, 128  }
 0xaaa   : > { %1681 = vsyncadd (!%p1568_p2), %s1399_s9, 4294967168  ;;  %p17_p3 = scmp.ge.s32.totalorder %s1778_s30, 4   ;;  %s2017_s24 = smov %s1688_s25 }
 0xaab   : > { %s2018_s25 = smov %s1692_s26  ;;  %s2019_s26 = smov %s1789_s10 }
 0xaac   : > { %s2020_s27 = smov %s1778_s30  ;;  %19 = sbr.rel (!%p17_p3) target bundleno = 3 (0x3), region = 83 }
 0xab3   :  { %1404 = vsyncpa [#allocation3], 1 }
 0xab4   :  { %1406 = vsyncpa [#allocation3 + $0x1], 1 }

</bundles_post_ra>
